<compile_context>
chip_gen: v7x
topology: tpu7x:2x2x1
jax: 0.10.0
libtpu: 0.0.40
codegen_flags: <defaults>
</compile_context>

<pallas_src>
import jax
import jax.numpy as jnp
from jax.experimental import pallas as pl
from jax.experimental.pallas import tpu as pltpu


def _round_up(x: int, m: int) -> int:
    return ((x + m - 1) // m) * m


def _mlp_kernel(xT_ref, w1_ref, b1_ref, w2_ref, b2_ref, w3_ref, b3_ref, o_ref):
    # xT_ref: (3, TB) batch tile, batch on the lane axis.
    xT = xT_ref[...]                                                   # (3, TB) f32

    # fc1 + ReLU:  (64, 3) @ (3, TB) -> (64, TB)
    h1 = jnp.dot(w1_ref[...], xT, preferred_element_type=jnp.float32) + b1_ref[...]
    h1 = jnp.maximum(h1, 0.0)

    # fc2 + ReLU:  (32, 64) @ (64, TB) -> (32, TB)
    h2 = jnp.dot(w2_ref[...], h1, preferred_element_type=jnp.float32) + b2_ref[...]
    h2 = jnp.maximum(h2, 0.0)

    # fc3 (no activation):  (1, 32) @ (32, TB) -> (1, TB); bias is an SMEM scalar.
    out = jnp.dot(w3_ref[...], h2, preferred_element_type=jnp.float32) + b3_ref[0, 0]
    o_ref[...] = out.astype(o_ref.dtype)


def water_capacity_forward(x, params, *, batch_tile: int = 2048):
    """x: (B, 3) float32 -> (B, 1) float32. params: PyTorch-layout weights/biases."""
    w1, b1 = params["w1"], params["b1"]          # (64, 3), (64, 1)
    w2, b2 = params["w2"], params["b2"]          # (32, 64), (32, 1)
    w3, b3 = params["w3"], params["b3"]          # (1, 32), (1, 1)

    B = x.shape[0]
    # Lane-dense tile: a multiple of 128 lanes; don't over-tile tiny batches.
    tb = min(batch_tile, _round_up(B, 128))
    pB = _round_up(B, tb)
    grid = (pB // tb,)

    # Layout plumbing in the wrapper: batch onto the lane axis, pad to the tile size.
    xT = jnp.pad(jnp.transpose(x), ((0, 0), (0, pB - B)))              # (3, pB)

    flops = 2 * B * (3 * 64 + 64 * 32 + 32 * 1)
    bytes_accessed = 4 * (B * 3 + B * 1) + 4 * (64 * 3 + 64 + 32 * 64 + 32 + 32 + 1)

    const2d = lambda i: (0, 0)  # weights/biases: same block every step -> stay resident

    out_t = pl.pallas_call(
        _mlp_kernel,
        out_shape=jax.ShapeDtypeStruct((1, pB), jnp.float32),
        grid=grid,
        in_specs=[
            pl.BlockSpec((3, tb), lambda i: (0, i)),                   # x^T batch tile
            pl.BlockSpec((64, 3), const2d),                            # w1
            pl.BlockSpec((64, 1), const2d),                            # b1
            pl.BlockSpec((32, 64), const2d),                           # w2
            pl.BlockSpec((32, 1), const2d),                            # b2
            pl.BlockSpec((1, 32), const2d),                            # w3
            pl.BlockSpec(memory_space=pltpu.MemorySpace.SMEM),         # b3 scalar
        ],
        out_specs=pl.BlockSpec((1, tb), lambda i: (0, i)),             # lane-dense out
        compiler_params=pltpu.CompilerParams(
            dimension_semantics=("parallel",),                         # v7x: shard tiles over both TCs
        ),
        cost_estimate=pl.CostEstimate(
            flops=flops, transcendentals=0, bytes_accessed=bytes_accessed
        ),
    )(xT, w1, b1, w2, b2, w3, b3)

    # Back to the PyTorch-style (B, 1) output (drop batch padding).
    return jnp.transpose(out_t[:, :B])


def init_params(key):
    """nn.Linear-style init U(-1/sqrt(fan_in), 1/sqrt(fan_in)), PyTorch (out, in) layout."""
    def linear(key, fan_in, fan_out):
        kw, kb = jax.random.split(key)
        bound = 1.0 / jnp.sqrt(fan_in)
        w = jax.random.uniform(kw, (fan_out, fan_in), jnp.float32, -bound, bound)
        b = jax.random.uniform(kb, (fan_out, 1), jnp.float32, -bound, bound)
        return w, b

    k1, k2, k3 = jax.random.split(key, 3)
    w1, b1 = linear(k1, 3, 64)
    w2, b2 = linear(k2, 64, 32)
    w3, b3 = linear(k3, 32, 1)
    return {"w1": w1, "b1": b1, "w2": w2, "b2": b2, "w3": w3, "b3": b3}


def reference_forward(x, params):
    # y = relu(x @ W1^T + b1) etc., matching torch.nn.Linear semantics.
    h1 = jnp.maximum(x @ params["w1"].T + params["b1"].T, 0.0)
    h2 = jnp.maximum(h1 @ params["w2"].T + params["b2"].T, 0.0)
    return h2 @ params["w3"].T + params["b3"].T


if __name__ == "__main__":
    key = jax.random.PRNGKey(0)
    kx, kp = jax.random.split(key)

    B = 8
    x = jax.random.normal(kx, (B, 3), dtype=jnp.float32)
    params = init_params(kp)

    out = water_capacity_forward(x, params)
    out = jax.block_until_ready(out)

    ref = reference_forward(x, params)
    assert out.shape == (B, 1)
    assert jnp.allclose(out, ref, atol=1e-5, rtol=1e-5)

    print("KERNEL_OK")
</pallas_src>

<mosaic_0001>
module attributes {stable_mosaic.version = 11 : i64} {
  func.func @_mlp_kernel(%arg0: i32, %arg1: memref<3x128xf32, #tpu.memory_space<vmem>>, %arg2: memref<64x3xf32, #tpu.memory_space<vmem>>, %arg3: memref<64x1xf32, #tpu.memory_space<vmem>>, %arg4: memref<32x64xf32, #tpu.memory_space<vmem>>, %arg5: memref<32x1xf32, #tpu.memory_space<vmem>>, %arg6: memref<1x32xf32, #tpu.memory_space<vmem>>, %arg7: memref<1x1xf32, #tpu.memory_space<smem>>, %arg8: memref<1x128xf32, #tpu.memory_space<vmem>>) attributes {dimension_semantics = [#tpu.dimension_semantics<parallel>], iteration_bounds = array<i64: 1>, scalar_prefetch = 0 : i64, scratch_operands = 0 : i64, tpu.core_type = #tpu.core_type<tc>, window_params = [{transform_indices = @transform_0, window_bounds = array<i64: 3, 128>}, {pipeline_mode = #tpu.pipeline_mode<synchronous>, transform_indices = @transform_1, window_bounds = array<i64: 64, 3>}, {pipeline_mode = #tpu.pipeline_mode<synchronous>, transform_indices = @transform_2, window_bounds = array<i64: 64, 1>}, {pipeline_mode = #tpu.pipeline_mode<synchronous>, transform_indices = @transform_3, window_bounds = array<i64: 32, 64>}, {pipeline_mode = #tpu.pipeline_mode<synchronous>, transform_indices = @transform_4, window_bounds = array<i64: 32, 1>}, {pipeline_mode = #tpu.pipeline_mode<synchronous>, transform_indices = @transform_5, window_bounds = array<i64: 1, 32>}, {transform_indices = @transform_6, window_bounds = array<i64: 1, 1>}, {transform_indices = @transform_7, window_bounds = array<i64: 1, 128>}]} {
    %c0 = arith.constant 0 : index
    %c0_0 = arith.constant 0 : index
    %0 = vector.load %arg1[%c0, %c0_0] : memref<3x128xf32, #tpu.memory_space<vmem>>, vector<3x128xf32>
    %c0_1 = arith.constant 0 : index
    %c0_2 = arith.constant 0 : index
    %1 = vector.load %arg2[%c0_1, %c0_2] : memref<64x3xf32, #tpu.memory_space<vmem>>, vector<64x3xf32>
    %cst = arith.constant dense<0.000000e+00> : vector<64x128xf32>
    %2 = tpu.matmul %1, %0, %cst {dimension_numbers = #tpu.dot_dimension_numbers<[1], [0], [0], [1], [0, 0, 1, 1], [], []>} : vector<64x3xf32>, vector<3x128xf32>, vector<64x128xf32> -> vector<64x128xf32>
    %c0_3 = arith.constant 0 : index
    %c0_4 = arith.constant 0 : index
    %3 = vector.load %arg3[%c0_3, %c0_4] : memref<64x1xf32, #tpu.memory_space<vmem>>, vector<64x1xf32>
    %4 = vector.broadcast %3 : vector<64x1xf32> to vector<64x128xf32>
    %5 = arith.addf %2, %4 : vector<64x128xf32>
    %cst_5 = arith.constant 0.000000e+00 : f32
    %6 = vector.broadcast %cst_5 : f32 to vector<64x128xf32>
    %7 = arith.maximumf %5, %6 : vector<64x128xf32>
    %c0_6 = arith.constant 0 : index
    %c0_7 = arith.constant 0 : index
    %8 = vector.load %arg4[%c0_6, %c0_7] : memref<32x64xf32, #tpu.memory_space<vmem>>, vector<32x64xf32>
    %cst_8 = arith.constant dense<0.000000e+00> : vector<32x128xf32>
    %9 = tpu.matmul %8, %7, %cst_8 {dimension_numbers = #tpu.dot_dimension_numbers<[1], [0], [0], [1], [0, 0, 1, 1], [], []>} : vector<32x64xf32>, vector<64x128xf32>, vector<32x128xf32> -> vector<32x128xf32>
    %c0_9 = arith.constant 0 : index
    %c0_10 = arith.constant 0 : index
    %10 = vector.load %arg5[%c0_9, %c0_10] : memref<32x1xf32, #tpu.memory_space<vmem>>, vector<32x1xf32>
    %11 = vector.broadcast %10 : vector<32x1xf32> to vector<32x128xf32>
    %12 = arith.addf %9, %11 : vector<32x128xf32>
    %cst_11 = arith.constant 0.000000e+00 : f32
    %13 = vector.broadcast %cst_11 : f32 to vector<32x128xf32>
    %14 = arith.maximumf %12, %13 : vector<32x128xf32>
    %c0_12 = arith.constant 0 : index
    %c0_13 = arith.constant 0 : index
    %15 = vector.load %arg6[%c0_12, %c0_13] : memref<1x32xf32, #tpu.memory_space<vmem>>, vector<1x32xf32>
    %cst_14 = arith.constant dense<0.000000e+00> : vector<1x128xf32>
    %16 = tpu.matmul %15, %14, %cst_14 {dimension_numbers = #tpu.dot_dimension_numbers<[1], [0], [0], [1], [0, 0, 1, 1], [], []>} : vector<1x32xf32>, vector<32x128xf32>, vector<1x128xf32> -> vector<1x128xf32>
    %c0_15 = arith.constant 0 : index
    %c0_16 = arith.constant 0 : index
    %17 = memref.load %arg7[%c0_15, %c0_16] : memref<1x1xf32, #tpu.memory_space<smem>>
    %18 = vector.broadcast %17 : f32 to vector<1x128xf32>
    %19 = arith.addf %16, %18 : vector<1x128xf32>
    %c0_17 = arith.constant 0 : index
    %c0_18 = arith.constant 0 : index
    %20 = vector.load %arg8[%c0_17, %c0_18] : memref<1x128xf32, #tpu.memory_space<vmem>>, vector<1x128xf32>
    tpu.vector_store %arg8[%c0_17, %c0_18], %19 {strides = array<i32>} : memref<1x128xf32, #tpu.memory_space<vmem>>, vector<1x128xf32>,
    return
  }
  func.func @transform_0(%arg0: i32) -> (i32, i32) {
    %c0_i32 = arith.constant 0 : i32
    %c0_i32_0 = arith.constant 0 : i32
    return %c0_i32, %arg0 : i32, i32
  }
  func.func @transform_1(%arg0: i32) -> (i32, i32) {
    %c0_i32 = arith.constant 0 : i32
    %c0_i32_0 = arith.constant 0 : i32
    %c0_i32_1 = arith.constant 0 : i32
    return %c0_i32, %c0_i32_0 : i32, i32
  }
  func.func @transform_2(%arg0: i32) -> (i32, i32) {
    %c0_i32 = arith.constant 0 : i32
    %c0_i32_0 = arith.constant 0 : i32
    %c0_i32_1 = arith.constant 0 : i32
    return %c0_i32, %c0_i32_0 : i32, i32
  }
  func.func @transform_3(%arg0: i32) -> (i32, i32) {
    %c0_i32 = arith.constant 0 : i32
    %c0_i32_0 = arith.constant 0 : i32
    %c0_i32_1 = arith.constant 0 : i32
    return %c0_i32, %c0_i32_0 : i32, i32
  }
  func.func @transform_4(%arg0: i32) -> (i32, i32) {
    %c0_i32 = arith.constant 0 : i32
    %c0_i32_0 = arith.constant 0 : i32
    %c0_i32_1 = arith.constant 0 : i32
    return %c0_i32, %c0_i32_0 : i32, i32
  }
  func.func @transform_5(%arg0: i32) -> (i32, i32) {
    %c0_i32 = arith.constant 0 : i32
    %c0_i32_0 = arith.constant 0 : i32
    %c0_i32_1 = arith.constant 0 : i32
    return %c0_i32, %c0_i32_0 : i32, i32
  }
  func.func @transform_6(%arg0: i32) -> (i32, i32) {
    %c0_i32 = arith.constant 0 : i32
    %c0_i32_0 = arith.constant 0 : i32
    %c0_i32_1 = arith.constant 0 : i32
    return %c0_i32, %c0_i32_0 : i32, i32
  }
  func.func @transform_7(%arg0: i32) -> (i32, i32) {
    %c0_i32 = arith.constant 0 : i32
    %c0_i32_0 = arith.constant 0 : i32
    return %c0_i32, %arg0 : i32, i32
  }
}

</mosaic_0001>

<bundles_post_ra>
// kernel: tpu_custom_call.1
= control target key start
LH: loop header
LB: loop body
LE: loop exit
PB: predicated region body
PF: predicated region fallthrough
CT: control target
= control target key end

     0   :  { %vm110_vm0 = vcmask 1042432   ;;  %vm85_vm1 = vcmask 23552   ;;  %v589_v4 = vmov 0   ;;  %s739_s0 = inlined_call_operand.vmem [shape: f32[3,128], index: 0, kind: input, shape index: {}]   ;;  %s740_s1 = inlined_call_operand.vmem [shape: f32[64,3], index: 1, kind: input, shape index: {}]   ;;  %s741_s2 = inlined_call_operand.vmem [shape: f32[64,1], index: 2, kind: input, shape index: {}]   ;;  %s742_s3 = inlined_call_operand.vmem [shape: f32[32,64], index: 3, kind: input, shape index: {}]   ;;  %s743_s4 = inlined_call_operand.vmem [shape: f32[32,1], index: 4, kind: input, shape index: {}]   ;;  %s744_s5 = inlined_call_operand.vmem [shape: f32[1,32], index: 5, kind: input, shape index: {}]   ;;  %s745_s6 = inlined_call_operand.<no memory space> [shape: f32[1,1], index: 6, kind: input, shape index: {}]   ;;  %s746_s7 = inlined_call_operand.hbm [shape: f32[1,128], index: 7, kind: output, shape index: {}]  }
   0x1   :  { %v28_v0 = vld [vmem:[%s739_s0] sm:$0x7]  ;;  %v30_v2 = vld [vmem:[%s740_s1 + $0x8] sm:$0xff]  ;;  %v31_v3 = vld [vmem:[%s740_s1 + $0x10] sm:$0xff]  ;;  %563 = vset.pattern.permute.xlu0 %v589_v4  ;;  %564 = vset.pattern.permute.xlu1 %v589_v4 }
   0x2   :  { %v29_v1 = vld [vmem:[%s740_s1] sm:$0xff]  ;;  %489 = vmatprep.subr.msk.mxu0 %vm110_vm0, %v28_v0  ;;  %v39_v6 = vld [vmem:[%s741_s2 + $0x10] sm:$0xff]  ;;  %v32_v7 = vld [vmem:[%s740_s1 + $0x18] sm:$0xff] }
   0x3   :  { %491 = vmatprep.mubr.msk.f32.mxu0 %vm85_vm1, %v29_v1  ;;  %490 = vmatpush3.msk.msra.mxu0 %vm110_vm0, %v28_v0  ;;  %v37_v5 = vld [vmem:[%s741_s2] sm:$0xff]  ;;  %v38_v9 = vld [vmem:[%s741_s2 + $0x8] sm:$0xff]  ;;  %v40_v10 = vld [vmem:[%s741_s2 + $0x18] sm:$0xff] }
   0x4   :  { %492 = vmatmul.mubr.msk.f32.vlgmr.msra.gmra.mrb[0].mxu0 %vm85_vm1, %v30_v2  ;;  %47 = vperm.xlu0 %563, %v37_v5   ;;  %v33_v8 = vld [vmem:[%s740_s1 + $0x20] sm:$0xff] }
   0x5   :  { %494 = vmatprep.mubr.msk.f32.mxu0 %vm85_vm1, %v31_v3  ;;  %57 = vperm.xlu1 %564, %v39_v6  }
   0x8   :  { %495 = vmatmul.mubr.msk.f32.gmra.mrb[2].mxu0 %vm85_vm1, %v32_v7 }
   0x9   :  { %13 = vsyncpa [#allocation4], 0  ;;  %497 = vmatprep.mubr.msk.f32.mxu0 %vm85_vm1, %v33_v8  ;;  %v34_v11 = vld [vmem:[%s740_s1 + $0x28] sm:$0xff]  ;;  %52 = vperm.xlu0 %563, %v38_v9   ;;  %v35_v12 = vld [vmem:[%s740_s1 + $0x30] sm:$0xff]  ;;  %vm255_vm2 = vcmask 523264   ;;  %v590_v62 = vmov 0.0|0.0  }
   0xa   :  { %62 = vperm.xlu1 %564, %v40_v10   ;;  %v41_v13 = vld [vmem:[%s741_s2 + $0x20] sm:$0xff]  ;;  %v42_v14 = vld [vmem:[%s741_s2 + $0x28] sm:$0xff]  ;;  %v36_v15 = vld [vmem:[%s740_s1 + $0x38] sm:$0xff]  ;;  %552 = vmatprep.subr.bf16.mxu0 %v590_v62  ;;  %vm591_vm3 = vmmov 0   ;;  %v592_v63 = vmov 0.0   ;;  %vm360_vm4 = vcmask 261120  }
   0xb   :  { %v43_v16 = vld [vmem:[%s741_s2 + $0x30] sm:$0xff]  ;;  %v44_v17 = vld [vmem:[%s741_s2 + $0x38] sm:$0xff]  ;;  %v231_v18 = vld [vmem:[%s743_s4] sm:$0xff]  ;;  %s593_s26 = smov [#allocation3]  }
   0xc   :  { %498 = vmatmul.mubr.msk.f32.gmra.mrb[4].mxu0 %vm85_vm1, %v34_v11  ;;  %v232_v19 = vld [vmem:[%s743_s4 + $0x8] sm:$0xff]  ;;  %v233_v20 = vld [vmem:[%s743_s4 + $0x10] sm:$0xff]  ;;  %v234_v21 = vld [vmem:[%s743_s4 + $0x18] sm:$0xff]  ;;  %s441_s27 = sshll.u32 %s593_s26, 4  ;;  %s442_s27 = int_to_ptr.vmem [resolvable:$true] %s441_s27 }
   0xd   :  { %500 = vmatprep.mubr.msk.f32.mxu0 %vm85_vm1, %v35_v12  ;;  %67 = vperm.xlu0 %563, %v41_v13   ;;  %v227_v22 = vld [vmem:[%s742_s3] sm:$0xff]  ;;  %v228_v59 = vld [vmem:[%s742_s3 + $0x8] sm:$0xff]  ;;  %v229_v60 = vld [vmem:[%s742_s3 + $0x10] sm:$0xff]  ;;  %s565_s28 = scalar_lea.vmem %s442_s27, 16  ;;  %s569_s29 = scalar_lea.vmem %s442_s27, 32 }
   0xe   :  { %72 = vperm.xlu1 %564, %v42_v14   ;;  %519 = vmatprep.mubr.msk.f32.mxu1 %vm255_vm2, %v227_v22  ;;  %v230_v61 = vld [vmem:[%s742_s3 + $0x18] sm:$0xff]  ;;  %p566_p0 = scmp.ne.s32.totalorder %s442_s27, %s565_s28  ;;  %p570_p1 = scmp.lt.s32.totalorder %s442_s27, %s442_s27 }
   0xf   :  { %p571_p2 = scmp.lt.s32.totalorder %s569_s29, %s565_s28 }
  0x10   :  { %501 = vmatmul.mubr.msk.f32.gmra.mrb[6].mxu0 %vm85_vm1, %v36_v15 }
  0x11   :  { %77 = vperm.xlu0 %563, %v43_v16   ;;  %533 = vmatprep.mubr.msk.f32.mxu0 %vm591_vm3, %v592_v63  ;;  %p572_p3 = por %p571_p2, %p570_p1 }
  0x12   :  { %82 = vperm.xlu1 %564, %v44_v17  }
  0x13   :  { %p573_p4 = pnand %p572_p3, %p566_p0 }
  0x15   :  { %237 = vperm.xlu0 %563, %v231_v18   ;;  %v357_v18 = vld [vmem:[%s744_s5] sm:$0x1] }
  0x16   :  { %242 = vperm.xlu1 %564, %v232_v19   ;;  %v359_v19 = vstv %s745_s6 }
  0x19   :  { %247 = vperm.xlu0 %563, %v233_v20  }
  0x1a   :  { %252 = vperm.xlu1 %564, %v234_v21  }
  0x83   :  { %v48_v23 = vpop.permute.xlu0 %47 }
  0x84   :  { %v58_v24 = vpop.permute.xlu1 %57 }
  0x88   :  { %v53_v25 = vpop.permute.xlu0 %52 }
  0x89   :  { %v63_v26 = vpop.permute.xlu1 %62 }
  0x8c   :  { %v68_v39 = vpop.permute.xlu0 %67 }
  0x8d   :  { %v73_v36 = vpop.permute.xlu1 %72 }
  0x90   :  { %v78_v51 = vpop.permute.xlu0 %77 }
  0x91   :  { %v83_v48 = vpop.permute.xlu1 %82 }
  0x94   :  { %v238_v1 = vpop.permute.xlu0 %237 }
  0x95   :  { %v243_v0 = vpop.permute.xlu1 %242 }
  0x98   :  { %v248_v10 = vpop.permute.xlu0 %247 }
  0x99   :  { %v253_v7 = vpop.permute.xlu1 %252 }
  0xd7   :  { %v493_v27 = vpop.f32.mrb[0].mxu0 }
  0xd8   :  { %v186_v28 = vadd.f32 %v493_v27, %v53_v25  ;;  %v180_v29 = vpop.f32.mrb[1].mxu0 }
  0xd9   :  { %v181_v30 = vadd.f32 %v180_v29, %v48_v23 }
  0xda   :  { %v220_v31 = vmax.f32 %v186_v28, 0.0 }
  0xdb   :  { %v219_v32 = vmax.f32 %v181_v30, 0.0  ;;  %v496_v33 = vpop.f32.mrb[2].mxu0 }
  0xdc   :  { %v196_v34 = vadd.f32 %v496_v33, %v63_v26  ;;  %v190_v35 = vpop.f32.mrb[3].mxu0 }
  0xdd   :  { %v191_v37 = vadd.f32 %v190_v35, %v58_v24  ;;  %v536_v38 = vpack.c.bf16 %v220_v31, %v219_v32 }
  0xde   :  { %v222_v40 = vmax.f32 %v196_v34, 0.0 }
  0xdf   :  { %v221_v41 = vmax.f32 %v191_v37, 0.0  ;;  %v499_v42 = vpop.f32.mrb[4].mxu0  ;;  %537 = vmatprep.subr.bf16.mxu1 %v536_v38 }
  0xe0   :  { %v206_v43 = vadd.f32 %v499_v42, %v73_v36  ;;  %v200_v44 = vpop.f32.mrb[5].mxu0  ;;  %539 = vmatpush3.bf16.msra.mxu1 %v536_v38 }
  0xe1   :  { %v540_v45 = vpack.c.bf16 %v222_v40, %v221_v41  ;;  %v201_v46 = vadd.f32 %v200_v44, %v68_v39 }
  0xe2   :  { %v224_v47 = vmax.f32 %v206_v43, 0.0 }
  0xe3   :  { %v223_v49 = vmax.f32 %v201_v46, 0.0  ;;  %v502_v50 = vpop.f32.mrb[6].mxu0  ;;  %541 = vmatprep.subr.bf16.mxu1 %v540_v45 }
  0xe4   :  { %v216_v52 = vadd.f32 %v502_v50, %v83_v48  ;;  %v210_v53 = vpop.f32.mrb[7].mxu0  ;;  %543 = vmatpush3.bf16.msra.mxu1 %v540_v45 }
  0xe5   :  { %v544_v54 = vpack.c.bf16 %v224_v47, %v223_v49  ;;  %v211_v55 = vadd.f32 %v210_v53, %v78_v51 }
  0xe6   :  { %v226_v56 = vmax.f32 %v216_v52, 0.0 }
  0xe7   :  { %v225_v57 = vmax.f32 %v211_v55, 0.0  ;;  %545 = vmatprep.subr.bf16.mxu1 %v544_v54 }
  0xe8   :  { %547 = vmatpush3.bf16.msra.mxu1 %v544_v54 }
  0xe9   :  { %v548_v58 = vpack.c.bf16 %v226_v56, %v225_v57 }
  0xeb   :  { %549 = vmatprep.subr.bf16.mxu1 %v548_v58 }
  0xec   :  { %551 = vmatpush3.bf16.msra.mxu1 %v548_v58 }
  0xef   :  { %520 = vmatmul.mubr.msk.f32.vlgmr.msra.gmra.mrb[0].mxu1 %vm255_vm2, %v228_v59 }
  0xf0   :  { %522 = vmatprep.mubr.msk.f32.mxu1 %vm255_vm2, %v229_v60 }
  0xf3   :  { %523 = vmatmul.mubr.msk.f32.gmra.mrb[2].mxu1 %vm255_vm2, %v230_v61 }
 0x1c2   :  { %v521_v2 = vpop.f32.mrb[0].mxu1 }
 0x1c3   :  { %v340_v3 = vadd.f32 %v521_v2, %v243_v0  ;;  %v334_v4 = vpop.f32.mrb[1].mxu1 }
 0x1c4   :  { %v335_v5 = vadd.f32 %v334_v4, %v238_v1 }
 0x1c5   :  { %v354_v6 = vmax.f32 %v340_v3, 0.0 }
 0x1c6   :  { %v353_v8 = vmax.f32 %v335_v5, 0.0  ;;  %v524_v9 = vpop.f32.mrb[2].mxu1 }
 0x1c7   :  { %v350_v11 = vadd.f32 %v524_v9, %v253_v7  ;;  %v344_v12 = vpop.f32.mrb[3].mxu1 }
 0x1c8   :  { %v553_v13 = vpack.c.bf16 %v354_v6, %v353_v8  ;;  %v345_v14 = vadd.f32 %v344_v12, %v248_v10 }
 0x1c9   :  { %v356_v15 = vmax.f32 %v350_v11, 0.0 }
 0x1ca   :  { %v355_v16 = vmax.f32 %v345_v14, 0.0  ;;  %554 = vmatpush3.bf16.msra.mxu0 %v553_v13 }
 0x1cb   :  { %555 = vmatprep.subr.bf16.mxu0 %v590_v62 }
 0x1cc   :  { %v556_v17 = vpack.c.bf16 %v356_v15, %v355_v16 }
 0x1ce   :  { %557 = vmatpush3.bf16.msra.mxu0 %v556_v17 }
 0x1d1   :  { %534 = vmatmul.mubr.msk.f32.vlgmr.msra.gmra.mrb[8].mxu0 %vm360_vm4, %v357_v18 }
 0x2a4   :  { %v430_v20 = vpop.f32.mrb[8].mxu0 }
 0x2a5   :  { %v431_v21 = vadd.f32 %v430_v20, %v359_v19  ;;  %v535_v22 = vpop.f32.mrb[9].mxu0 }
 0x2a7   :  { %434 = vst [vmem:[#allocation3] sm:$0x1] %v431_v21 }
 0x2a8   :  { %576 = shalt.err (!%p573_p4)
}
 0x2a9   :  { %s577_s8 = scalar_lea.hbm %s746_s7, 16 }
 0x2aa   :  { %p578_p5 = scmp.ne.s32.totalorder %s746_s7, %s577_s8  ;;  %p581_p6 = scmp.lt.u32.totalorder %s577_s8, %s746_s7 }
 0x2ac   :  { %p583_p7 = pnand %p581_p6, %p578_p5 }
 0x2ae   :  { %586 = shalt.err (!%p583_p7)
}
 0x2af   :  { %444 = dma.vmem_to_hbm [thread:$0]  %s442_s27, 16, %s746_s7, [#allocation4]  }
 0x2b0   :  { %587 = dma.done.wait [#allocation4], 16  }
 0x2b1   :  { %588 = vsyncadd [#allocation4], 4294967280 }
 0x2b2   :  { %448 = vsyncpa [#allocation4], 1 }

</bundles_post_ra>
